<compile_context>
chip_gen: v5e
topology: v5e:2x2
jax: 0.10.0
libtpu: 0.0.40
codegen_flags: <defaults>
</compile_context>

<pallas_src>
import jax
import jax.numpy as jnp
from jax.experimental import pallas as pl
from jax.experimental.pallas import tpu as pltpu

H1, H2 = 10, 5          # hidden sizes from the PyTorch module (fc1=10, fc2=5)
NEG_BIG = -1e30         # "minus infinity" bias for padded class lanes


def _round_up(n, m):
    return ((n + m - 1) // m) * m


def _pick_tile(B, tile_b):
    """Batch tile: multiple of 16 (bf16 sublane pack), sized for megacore."""
    tile_b = max(16, (int(tile_b) // 16) * 16)
    if B <= tile_b:
        if B >= 256:
            # big-enough batch in one tile: split in two so both v7x TCs work
            return min(tile_b, _round_up(pl.cdiv(B, 2), 16))
        return B                       # tiny batch: one full-extent tile
    if pl.cdiv(B, tile_b) < 8:
        # keep >= 8 grid steps for megacore sharding on large batches
        tile_b = max(16, min(tile_b, _round_up(pl.cdiv(B, 8), 16)))
    return tile_b


def mlp_kernel(x_ref, w1_ref, b1_ref, w2_ref, b2_ref, w3_ref, b3_ref, o_ref):
    # Cast to bf16 in-kernel (rides the idle VPU) -- x stays f32 in HBM.
    x = x_ref[...].astype(jnp.bfloat16)                          # (TB, F)

    # fc1 + ReLU   (bf16 MXU operands, f32 accumulate + f32 elementwise)
    h1 = jnp.dot(x, w1_ref[...], preferred_element_type=jnp.float32) + b1_ref[...]
    h1 = jnp.maximum(h1, 0.0)                                    # (TB, 10) f32

    # fc2 + ReLU
    h2 = jnp.dot(h1.astype(jnp.bfloat16), w2_ref[...],
                 preferred_element_type=jnp.float32) + b2_ref[...]
    h2 = jnp.maximum(h2, 0.0)                                    # (TB, 5) f32

    # fc5 -- class dim padded to 128 lanes IN-REGISTER only; padded lanes get
    # a -1e30 bias so softmax assigns them exactly zero probability.
    logits = jnp.dot(h2.astype(jnp.bfloat16), w3_ref[...],
                     preferred_element_type=jnp.float32) + b3_ref[...]

    # Numerically stable softmax over classes (exact divide: free, HBM-bound).
    m = jnp.max(logits, axis=1, keepdims=True)
    e = jnp.exp(logits - m)
    probs = e / jnp.sum(e, axis=1, keepdims=True)                # (TB, C_PAD)

    # Store only the real classes -- no padding bytes go to HBM.
    o_ref[...] = probs[:, : o_ref.shape[1]]


def mlp_forward(x, params, num_classes, *, tile_b=2048):
    """x: (B, F) float32. Returns (B, num_classes) float32 softmax probabilities."""
    w1, b1, w2, b2, w3, b3 = params
    B, F = x.shape
    C = num_classes
    c_pad = _round_up(C, 128)          # lane-dense compute width (in-register only)

    # Pad last layer's class dim for in-kernel compute (layout plumbing only;
    # the padded lanes never reach HBM on the output side).
    w3p = jnp.zeros((H2, c_pad), jnp.bfloat16).at[:, :C].set(w3)
    b3p = jnp.full((1, c_pad), NEG_BIG, jnp.float32).at[:, :C].set(b3)

    tb = _pick_tile(B, tile_b)
    grid = (pl.cdiv(B, tb),)           # ragged last tile handled by masking
    const = lambda i: (0, 0)           # weights/biases stay VMEM-resident

    param_bytes = sum(int(a.size * a.dtype.itemsize)
                      for a in (w1, b1, w2, b2, w3p, b3p))
    cost = pl.CostEstimate(
        flops=2 * B * (F * H1 + H1 * H2 + H2 * c_pad),
        transcendentals=B * c_pad,
        bytes_accessed=B * F * 4 + B * C * 4 + param_bytes,
    )

    out = pl.pallas_call(
        mlp_kernel,
        out_shape=jax.ShapeDtypeStruct((B, C), jnp.float32),
        grid=grid,
        in_specs=[
            pl.BlockSpec((tb, F), lambda i: (i, 0)),       # x tile (streamed, f32)
            pl.BlockSpec((F, H1), const),                  # w1
            pl.BlockSpec((1, H1), const),                  # b1
            pl.BlockSpec((H1, H2), const),                 # w2
            pl.BlockSpec((1, H2), const),                  # b2
            pl.BlockSpec((H2, c_pad), const),              # w3 (lane-padded, compute only)
            pl.BlockSpec((1, c_pad), const),               # b3 (lane-padded, compute only)
        ],
        out_specs=pl.BlockSpec((tb, C), lambda i: (i, 0)), # trimmed output block
        compiler_params=pltpu.CompilerParams(
            dimension_semantics=("parallel",),             # shard batch over TCs (v7x)
            vmem_limit_bytes=32 * 1024 * 1024,             # <= 48 MiB: safe on v7x
        ),
        cost_estimate=cost,
    )(x, w1, b1, w2, b2, w3p, b3p)

    return out


def init_params(key, in_features, num_classes):
    """nn.Linear-style init (U[-1/sqrt(fan_in), 1/sqrt(fan_in)]).
    Weights stored (in, out) -- transpose of PyTorch's (out, in) -- in bf16 for
    the MXU; biases kept f32 for the f32 elementwise path."""
    dims = [(in_features, H1), (H1, H2), (H2, num_classes)]
    params = []
    for fan_in, fan_out in dims:
        key, kw, kb = jax.random.split(key, 3)
        bound = 1.0 / jnp.sqrt(float(fan_in))
        w = jax.random.uniform(kw, (fan_in, fan_out), jnp.float32, -bound, bound)
        b = jax.random.uniform(kb, (1, fan_out), jnp.float32, -bound, bound)
        params += [w.astype(jnp.bfloat16), b]
    return tuple(params)


def mlp_reference(x, params):
    """Pure-JAX reference mirroring the kernel's bf16-operand / f32-accumulate math."""
    w1, b1, w2, b2, w3, b3 = params
    xb = x.astype(jnp.bfloat16)
    h1 = jnp.maximum(jnp.dot(xb, w1, preferred_element_type=jnp.float32) + b1, 0.0)
    h2 = jnp.maximum(
        jnp.dot(h1.astype(jnp.bfloat16), w2, preferred_element_type=jnp.float32) + b2, 0.0)
    logits = jnp.dot(h2.astype(jnp.bfloat16), w3, preferred_element_type=jnp.float32) + b3
    return jax.nn.softmax(logits, axis=1)


if __name__ == "__main__":
    key = jax.random.PRNGKey(0)
    k_x, k_p = jax.random.split(key)

    batch = 200          # not a tile multiple -> exercises the ragged last tile
    in_features = 32
    num_classes = 2

    x = jax.random.normal(k_x, (batch, in_features), jnp.float32)
    params = init_params(k_p, in_features, num_classes)

    # Small tile so the multi-step grid + resident-weight + masked-tail paths
    # are all exercised (picker shrinks 64 -> 32 for >=8 grid steps).
    out = mlp_forward(x, params, num_classes, tile_b=64)
    out = jax.block_until_ready(out)

    ref = mlp_reference(x, params)
    assert out.shape == (batch, num_classes)
    # bf16 MXU operands -> compare at 2e-3
    assert jnp.allclose(out, ref, atol=2e-3, rtol=2e-3)
    # exact divide -> rows of the softmax sum to 1 (f32 rounding only)
    assert jnp.allclose(jnp.sum(out, axis=1), jnp.ones((batch,)), atol=1e-4)

    print("KERNEL_OK")
</pallas_src>

<mosaic_0001>
module attributes {stable_mosaic.version = 11 : i64} {
  func.func @mlp_kernel(%arg0: i32, %arg1: memref<32x32xf32, #tpu.memory_space<vmem>>, %arg2: memref<32x10xbf16, #tpu.memory_space<vmem>>, %arg3: memref<1x10xf32, #tpu.memory_space<vmem>>, %arg4: memref<10x5xbf16, #tpu.memory_space<vmem>>, %arg5: memref<1x5xf32, #tpu.memory_space<vmem>>, %arg6: memref<5x128xbf16, #tpu.memory_space<vmem>>, %arg7: memref<1x128xf32, #tpu.memory_space<vmem>>, %arg8: memref<32x2xf32, #tpu.memory_space<vmem>>) attributes {dimension_semantics = [#tpu.dimension_semantics<parallel>], iteration_bounds = array<i64: 7>, scalar_prefetch = 0 : i64, scratch_operands = 0 : i64, tpu.core_type = #tpu.core_type<tc>, window_params = [{transform_indices = @transform_0, window_bounds = array<i64: 32, 32>}, {pipeline_mode = #tpu.pipeline_mode<synchronous>, transform_indices = @transform_1, window_bounds = array<i64: 32, 10>}, {pipeline_mode = #tpu.pipeline_mode<synchronous>, transform_indices = @transform_2, window_bounds = array<i64: 1, 10>}, {pipeline_mode = #tpu.pipeline_mode<synchronous>, transform_indices = @transform_3, window_bounds = array<i64: 10, 5>}, {pipeline_mode = #tpu.pipeline_mode<synchronous>, transform_indices = @transform_4, window_bounds = array<i64: 1, 5>}, {pipeline_mode = #tpu.pipeline_mode<synchronous>, transform_indices = @transform_5, window_bounds = array<i64: 5, 128>}, {pipeline_mode = #tpu.pipeline_mode<synchronous>, transform_indices = @transform_6, window_bounds = array<i64: 1, 128>}, {transform_indices = @transform_7, window_bounds = array<i64: 32, 2>}]} {
    %c0 = arith.constant 0 : index
    %c0_0 = arith.constant 0 : index
    %0 = vector.load %arg1[%c0, %c0_0] : memref<32x32xf32, #tpu.memory_space<vmem>>, vector<32x32xf32>
    %1 = arith.truncf %0 : vector<32x32xf32> to vector<32x32xbf16>
    %c0_1 = arith.constant 0 : index
    %c0_2 = arith.constant 0 : index
    %2 = vector.load %arg2[%c0_1, %c0_2] : memref<32x10xbf16, #tpu.memory_space<vmem>>, vector<32x10xbf16>
    %cst = arith.constant dense<0.000000e+00> : vector<32x10xf32>
    %3 = tpu.matmul %1, %2, %cst {dimension_numbers = #tpu.dot_dimension_numbers<[1], [0], [0], [1], [0, 0, 1, 1], [], []>} : vector<32x32xbf16>, vector<32x10xbf16>, vector<32x10xf32> -> vector<32x10xf32>
    %c0_3 = arith.constant 0 : index
    %c0_4 = arith.constant 0 : index
    %4 = vector.load %arg3[%c0_3, %c0_4] : memref<1x10xf32, #tpu.memory_space<vmem>>, vector<1x10xf32>
    %5 = vector.broadcast %4 : vector<1x10xf32> to vector<32x10xf32>
    %6 = arith.addf %3, %5 : vector<32x10xf32>
    %cst_5 = arith.constant 0.000000e+00 : f32
    %7 = vector.broadcast %cst_5 : f32 to vector<32x10xf32>
    %8 = arith.maximumf %6, %7 : vector<32x10xf32>
    %9 = arith.truncf %8 : vector<32x10xf32> to vector<32x10xbf16>
    %c0_6 = arith.constant 0 : index
    %c0_7 = arith.constant 0 : index
    %10 = vector.load %arg4[%c0_6, %c0_7] : memref<10x5xbf16, #tpu.memory_space<vmem>>, vector<10x5xbf16>
    %cst_8 = arith.constant dense<0.000000e+00> : vector<32x5xf32>
    %11 = tpu.matmul %9, %10, %cst_8 {dimension_numbers = #tpu.dot_dimension_numbers<[1], [0], [0], [1], [0, 0, 1, 1], [], []>} : vector<32x10xbf16>, vector<10x5xbf16>, vector<32x5xf32> -> vector<32x5xf32>
    %c0_9 = arith.constant 0 : index
    %c0_10 = arith.constant 0 : index
    %12 = vector.load %arg5[%c0_9, %c0_10] : memref<1x5xf32, #tpu.memory_space<vmem>>, vector<1x5xf32>
    %13 = vector.broadcast %12 : vector<1x5xf32> to vector<32x5xf32>
    %14 = arith.addf %11, %13 : vector<32x5xf32>
    %cst_11 = arith.constant 0.000000e+00 : f32
    %15 = vector.broadcast %cst_11 : f32 to vector<32x5xf32>
    %16 = arith.maximumf %14, %15 : vector<32x5xf32>
    %17 = arith.truncf %16 : vector<32x5xf32> to vector<32x5xbf16>
    %c0_12 = arith.constant 0 : index
    %c0_13 = arith.constant 0 : index
    %18 = vector.load %arg6[%c0_12, %c0_13] : memref<5x128xbf16, #tpu.memory_space<vmem>>, vector<5x128xbf16>
    %cst_14 = arith.constant dense<0.000000e+00> : vector<32x128xf32>
    %19 = tpu.matmul %17, %18, %cst_14 {dimension_numbers = #tpu.dot_dimension_numbers<[1], [0], [0], [1], [0, 0, 1, 1], [], []>} : vector<32x5xbf16>, vector<5x128xbf16>, vector<32x128xf32> -> vector<32x128xf32>
    %c0_15 = arith.constant 0 : index
    %c0_16 = arith.constant 0 : index
    %20 = vector.load %arg7[%c0_15, %c0_16] : memref<1x128xf32, #tpu.memory_space<vmem>>, vector<1x128xf32>
    %21 = vector.broadcast %20 : vector<1x128xf32> to vector<32x128xf32>
    %22 = arith.addf %19, %21 : vector<32x128xf32>
    %cst_17 = arith.constant dense<0xFF800000> : vector<32xf32>
    %23 = vector.multi_reduction <maximumf>, %22, %cst_17 [1] : vector<32x128xf32> to vector<32xf32>
    %24 = vector.shape_cast %23 : vector<32xf32> to vector<32x1xf32>
    %25 = vector.broadcast %24 : vector<32x1xf32> to vector<32x128xf32>
    %26 = arith.subf %22, %25 : vector<32x128xf32>
    %27 = math.exp %26 : vector<32x128xf32>
    %cst_18 = arith.constant dense<0.000000e+00> : vector<32xf32>
    %28 = vector.multi_reduction <add>, %27, %cst_18 [1] : vector<32x128xf32> to vector<32xf32>
    %29 = vector.shape_cast %28 : vector<32xf32> to vector<32x1xf32>
    %30 = vector.broadcast %29 : vector<32x1xf32> to vector<32x128xf32>
    %31 = arith.divf %27, %30 : vector<32x128xf32>
    %32 = vector.extract_strided_slice %31 {offsets = [0, 0], sizes = [32, 2], strides = [1, 1]} : vector<32x128xf32> to vector<32x2xf32>
    %c0_19 = arith.constant 0 : index
    %c0_20 = arith.constant 0 : index
    %33 = vector.load %arg8[%c0_19, %c0_20] : memref<32x2xf32, #tpu.memory_space<vmem>>, vector<32x2xf32>
    tpu.vector_store %arg8[%c0_19, %c0_20], %32 {strides = array<i32>} : memref<32x2xf32, #tpu.memory_space<vmem>>, vector<32x2xf32>,
    return
  }
  func.func @transform_0(%arg0: i32) -> (i32, i32) {
    %c0_i32 = arith.constant 0 : i32
    %c0_i32_0 = arith.constant 0 : i32
    return %arg0, %c0_i32 : i32, i32
  }
  func.func @transform_1(%arg0: i32) -> (i32, i32) {
    %c0_i32 = arith.constant 0 : i32
    %c0_i32_0 = arith.constant 0 : i32
    %c0_i32_1 = arith.constant 0 : i32
    return %c0_i32, %c0_i32_0 : i32, i32
  }
  func.func @transform_2(%arg0: i32) -> (i32, i32) {
    %c0_i32 = arith.constant 0 : i32
    %c0_i32_0 = arith.constant 0 : i32
    %c0_i32_1 = arith.constant 0 : i32
    return %c0_i32, %c0_i32_0 : i32, i32
  }
  func.func @transform_3(%arg0: i32) -> (i32, i32) {
    %c0_i32 = arith.constant 0 : i32
    %c0_i32_0 = arith.constant 0 : i32
    %c0_i32_1 = arith.constant 0 : i32
    return %c0_i32, %c0_i32_0 : i32, i32
  }
  func.func @transform_4(%arg0: i32) -> (i32, i32) {
    %c0_i32 = arith.constant 0 : i32
    %c0_i32_0 = arith.constant 0 : i32
    %c0_i32_1 = arith.constant 0 : i32
    return %c0_i32, %c0_i32_0 : i32, i32
  }
  func.func @transform_5(%arg0: i32) -> (i32, i32) {
    %c0_i32 = arith.constant 0 : i32
    %c0_i32_0 = arith.constant 0 : i32
    %c0_i32_1 = arith.constant 0 : i32
    return %c0_i32, %c0_i32_0 : i32, i32
  }
  func.func @transform_6(%arg0: i32) -> (i32, i32) {
    %c0_i32 = arith.constant 0 : i32
    %c0_i32_0 = arith.constant 0 : i32
    %c0_i32_1 = arith.constant 0 : i32
    return %c0_i32, %c0_i32_0 : i32, i32
  }
  func.func @transform_7(%arg0: i32) -> (i32, i32) {
    %c0_i32 = arith.constant 0 : i32
    %c0_i32_0 = arith.constant 0 : i32
    return %arg0, %c0_i32 : i32, i32
  }
}

</mosaic_0001>

<bundles_post_ra>
// kernel: tpu_custom_call.1
= control target key start
LH: loop header
LB: loop body
LE: loop exit
PB: predicated region body
PF: predicated region fallthrough
CT: control target
= control target key end

     0   :  { %s1052_s24 = smov 0   ;;  %s1054_s25 = smov 0   ;;  %s1188_s0 = inlined_call_operand.vmem [shape: f32[200,32], index: 0, kind: input, shape index: {}]   ;;  %s1189_s1 = inlined_call_operand.vmem [shape: bf16[32,10], index: 1, kind: input, shape index: {}]   ;;  %s1190_s2 = inlined_call_operand.vmem [shape: f32[1,10], index: 2, kind: input, shape index: {}]   ;;  %s1191_s3 = inlined_call_operand.vmem [shape: bf16[10,5], index: 3, kind: input, shape index: {}]   ;;  %s1192_s4 = inlined_call_operand.vmem [shape: f32[1,5], index: 4, kind: input, shape index: {}]   ;;  %s1193_s5 = inlined_call_operand.vmem [shape: bf16[5,128], index: 5, kind: input, shape index: {}]   ;;  %s1194_s6 = inlined_call_operand.vmem [shape: f32[1,128], index: 6, kind: input, shape index: {}]   ;;  %s1195_s7 = inlined_call_operand.vmem [shape: f32[200,2], index: 7, kind: output, shape index: {}]  }
   0x1   :  { %s1056_s26 = smov 0  }
   0x2 LB: > { %s1065_s27 = sadd.s32 4294967295, %s977_s26   ;;  %s1067_s28 = sadd.s32 1, %s977_s26   ;;  %s977_s26 = sphi %s1056_s26, %s1202_s26   ;;  %s973_s25 = sphi %s1054_s25, %s1201_s25   ;;  %s969_s24 = sphi %s1052_s24, %s1200_s24  }
   0x3   : > { %s173_s29 = ssub.s32 %s977_s26, %s1067_s28  ;;  %s176_s30 = sadd.s32 1, %s973_s25 }
   0x4   : > { %p174_p0 = scmp.eq.s32.totalorder %s173_s29, 0  ;;  %p186_p1 = scmp.ne.s32.totalorder %s973_s25, %s969_s24 }
   0x5   : > { %p187_p2 = scmp.eq.s32.totalorder %s1065_s27, 6  ;;  %p768_p3 = scmp.ge.s32.totalorder %s977_s26, 1 }
   0x6   : > { %s1075_s8 = scalar_select %p174_p0, %s973_s25, %s176_s30  }
   0x7   : > { %p1077_p4 = por %p187_p2, %p186_p1  ;;  %p246_p5 = scmp.lt.s32.totalorder %s977_s26, 8 }
   0x9   : > { %p247_p6 = pnand %p768_p3, %p246_p5 }
   0xa   : > { %s1085_s12 = sshll.u32 (!%p247_p6), %s1065_s27, 2 }
   0xb   : > { %250 = sbr.rel (%p247_p6) target bundleno = 764 (0x2fc), region = 48  ;;  %p286_p7 = scmp.lt.s32.totalorder (!%p247_p6), %s1085_s12, 24 }
  0x10   : > { %v808_v0 = vld [vmem:[%s1189_s1 + $0x8] sm:$0xff]  ;;  %v807_v1 = vld [vmem:[%s1189_s1] sm:$0xff]  ;;  %s287_s15 = scalar_select %p286_p7, %s1085_s12, 24  ;;  %vm327_vm0 = vcmask 261120   ;;  %vm377_vm1 = vcmask 1044480   ;;  %vm370_vm2 = vcmask 80896  }
  0x11   : > { %340 = vmatpush.bf16.msra.mxu0 %v808_v0  ;;  %813 = vmatpush.bf16.msra.mxu3 %v808_v0  ;;  %v784_v8 = vld [vmem:[%s1191_s3] sm:$0xf]  ;;  %v809_v9 = vld [vmem:[%s1191_s3] sm:$0x10]  ;;  %vm418_vm3 = vcmask 1041408   ;;  %vm419_vm4 = vcmask 1042432  }
  0x12   : > { %s771_s16 = sshll.u32 %s287_s15, 3  ;;  %v785_v10 = vor.u32 %v809_v9, %v784_v8  ;;  %v904_v13 = vld [vmem:[%s1190_s2] ss:$0 sm:$0xff]  ;;  %v1011_v27 = vmov 65535   ;;  %vm411_vm5 = vcmask 39936   ;;  %vm532_vm10 = vcmask 15360  }
  0x13   : > { %s289_s19 = scalar_lea.vmem %s1188_s0, %s771_s16  ;;  %v420_v28 = vsel %vm418_vm3, 4294967295, %v1011_v27  ;;  %v406_v29 = vld [vmem:[%s1193_s5] sm:$0x7]  ;;  %s278_s16 = sand.u32 1, %s969_s24  }
  0x14   : > { %v301_v2 = vld [vmem:[%s289_s19] sm:$0xff]  ;;  %v302_v3 = vld [vmem:[%s289_s19 + $0x8] sm:$0xff]  ;;  %v303_v4 = vld [vmem:[%s289_s19 + $0x10] sm:$0xff]  ;;  %v379_v11 = vsel %vm377_vm1, %v785_v10, 0  ;;  %v421_v30 = vsel %vm419_vm4, %v420_v28, 0  ;;  %s769_s17 = sshll.u32 %s278_s16, 5 }
  0x15   : > { %341 = vmatpush.bf16.msra.mxu0 %v807_v1  ;;  %814 = vmatpush.bf16.msra.mxu3 %v807_v1  ;;  %v305_v5 = vpack.c.bf16 %v302_v3, %v301_v2  ;;  %v304_v6 = vld [vmem:[%s289_s19 + $0x18] sm:$0xff]  ;;  %v423_v31 = vand.u32 %v421_v30, %v406_v29  ;;  %v905_v33 = vld [vmem:[%s1192_s4] ss:$0 sm:$0xff]  ;;  %s1120_s24 = scalar_lea.vmem [#allocation2], %s769_s17   ;;  %s545_s18 = ssub.s32 (%p1077_p4), 25, %s1085_s12 }
  0x16   : > { %v306_v7 = vpack.c.bf16 %v304_v6, %v303_v4  ;;  %388 = vmatpush.bf16.msra.mxu1 %v379_v11  ;;  %v906_v47 = vld [vmem:[%s1194_s6] ss:$0 sm:$0xff]  ;;  %s810_s19 = sshll.u32 (%p1077_p4), %s1065_s27, 5  ;;  %p546_p8 = scmp.lt.s32.totalorder (%p1077_p4), %s545_s18, 4 }
  0x17   : > { %432 = vmatpush.bf16.msra.mxu2 %v423_v31  ;;  %s1139_s22 = scalar_lea.vmem (%p1077_p4), %s1195_s7, %s810_s19  }
  0x18   : > { %780 = vmatmul.msk.bf16.vlgmr.msra.gmra.mxu0 %vm327_vm0, %v305_v5  ;;  %781 = vmatmul.msk.bf16.vlgmr.msra.gmra.mxu3 %vm327_vm0, %v306_v7 }
  0x95   : > { %v343_v12 = vpop.f32.mrf.mxu0 }
  0x96   : > { %v344_v14 = vadd.f32 %v904_v13, %v343_v12 }
  0x98   : > { %v353_v18 = vmax.f32 %v344_v14, 0.0 }
  0x9b   : > { %v348_v16 = vpop.f32.mrf.mxu3 }
  0x9c   : > { %v349_v22 = vadd.f32 %v904_v13, %v348_v16 }
  0x9d   : > { %v345_v15 = vpop.f32.mrf.mxu0 }
  0x9e   : > { %v346_v17 = vadd.f32 %v904_v13, %v345_v15  ;;  %v355_v24 = vmax.f32 %v349_v22, 0.0 }
  0xa0   : > { %v354_v19 = vmax.f32 %v346_v17, 0.0 }
  0xa2   : > { %v357_v20 = vpack.c.bf16 %v354_v19, %v353_v18 }
  0xa3   : > { %v350_v21 = vpop.f32.mrf.mxu3 }
  0xa4   : > { %786 = vmatmul.msk.bf16.vlgmr.msra.gmra.mxu1 %vm370_vm2, %v357_v20  ;;  %v351_v23 = vadd.f32 %v904_v13, %v350_v21 }
  0xa6   : > { %v356_v25 = vmax.f32 %v351_v23, 0.0 }
  0xa8   : > { %v358_v26 = vpack.c.bf16 %v356_v25, %v355_v24 }
  0xb4   : > { %787 = vmatmul.msk.bf16.gmra.mxu1 %vm370_vm2, %v358_v26 }
 0x121   : > { %v390_v32 = vpop.f32.mrf.mxu1 }
 0x122   : > { %v391_v34 = vadd.f32 %v905_v33, %v390_v32 }
 0x124   : > { %v400_v37 = vmax.f32 %v391_v34, 0.0 }
 0x129   : > { %v392_v35 = vpop.f32.mrf.mxu1 }
 0x12a   : > { %v393_v36 = vadd.f32 %v905_v33, %v392_v35 }
 0x12c   : > { %v401_v38 = vmax.f32 %v393_v36, 0.0 }
 0x12e   : > { %v404_v39 = vpack.c.bf16 %v401_v38, %v400_v37 }
 0x130   : > { %788 = vmatmul.msk.bf16.vlgmr.msra.gmra.mxu2 %vm411_vm5, %v404_v39 }
 0x131   : > { %v395_v40 = vpop.f32.mrf.mxu1 }
 0x132   : > { %v396_v41 = vadd.f32 %v905_v33, %v395_v40 }
 0x134   : > { %v402_v44 = vmax.f32 %v396_v41, 0.0 }
 0x139   : > { %v397_v42 = vpop.f32.mrf.mxu1 }
 0x13a   : > { %v398_v43 = vadd.f32 %v905_v33, %v397_v42 }
 0x13c   : > { %v403_v45 = vmax.f32 %v398_v43, 0.0 }
 0x13e   : > { %v405_v46 = vpack.c.bf16 %v403_v45, %v402_v44 }
 0x140   : > { %789 = vmatmul.msk.bf16.gmra.mxu2 %vm411_vm5, %v405_v46 }
 0x1b3   : > { %v434_v48 = vpop.f32.mrf.mxu2 }
 0x1b4   : > { %v435_v49 = vadd.f32 %v906_v47, %v434_v48 }
 0x1b6   : > { %444 = vmax.xlane.f32.xlu0 %v435_v49 }
 0x1bb   : > { %v436_v50 = vpop.f32.mrf.mxu2 }
 0x1bc   : > { %v437_v51 = vadd.f32 %v906_v47, %v436_v50 }
 0x1be   : > { %446 = vmax.xlane.f32.xlu0 %v437_v51 }
 0x1c3   : > { %v439_v52 = vpop.f32.mrf.mxu2 }
 0x1c4   : > { %v440_v53 = vadd.f32 %v906_v47, %v439_v52 }
 0x1c6   : > { %448 = vmax.xlane.f32.xlu1 %v440_v53 }
 0x1cb   : > { %v441_v54 = vpop.f32.mrf.mxu2 }
 0x1cc   : > { %v442_v55 = vadd.f32 %v906_v47, %v441_v54 }
 0x1ce   : > { %450 = vmax.xlane.f32.xlu1 %v442_v55 }
 0x229   : > { %v445_v56 = vpop.xlane.xlu0 %444 }
 0x22a   : > { %v452_v57 = vsub.f32 %v435_v49, %v445_v56 }
 0x22c   : > { %v456_v58 = vmul.f32 1.442695, %v452_v57 }
 0x22e   : > { %907 = vpow2.f32 %v456_v58 }
 0x231   : > { %v447_v59 = vpop.xlane.xlu0 %446 }
 0x232   : > { %v453_v60 = vsub.f32 %v437_v51, %v447_v59 }
 0x234   : > { %v908_v61 = vpop.eup %907  ;;  %v458_v62 = vmul.f32 1.442695, %v453_v60 }
 0x235   : > { %464 = vadd.xlane.f32.xlu2 %v908_v61 }
 0x236   : > { %909 = vpow2.f32 %v458_v62 }
 0x239   : > { %v449_v63 = vpop.xlane.xlu1 %448 }
 0x23a   : > { %v454_v0 = vsub.f32 %v440_v53, %v449_v63 }
 0x23c   : > { %v910_v1 = vpop.eup %909  ;;  %v460_v2 = vmul.f32 1.442695, %v454_v0 }
 0x23d   : > { %466 = vadd.xlane.f32.xlu2 %v910_v1 }
 0x23e   : > { %911 = vpow2.f32 %v460_v2 }
 0x241   : > { %v451_v3 = vpop.xlane.xlu1 %450 }
 0x242   : > { %v455_v4 = vsub.f32 %v442_v55, %v451_v3 }
 0x244   : > { %v1113_v5 = vpop.eup %911  ;;  %v462_v6 = vmul.f32 1.442695, %v455_v4 }
 0x245   : > { %468 = vadd.xlane.f32.xlu0 %v1113_v5 }
 0x246   : > { %913 = vpow2.f32 %v462_v6 }
 0x24c   : > { %v1116_v7 = vpop.eup %913 }
 0x24d   : > { %470 = vadd.xlane.f32.xlu1 %v1116_v7 }
 0x2a8   : > { %v465_v8 = vpop.xlane.xlu2 %464 }
 0x2a9   : > { %915 = vrcp.f32 %v465_v8  ;;  %v483_v13 = vand.u32 2147483648, %v465_v8  ;;  %v481_v15 = vand.u32 2147483647, %v465_v8  ;;  %vm477_vm7 = vweird.f32 %v465_v8 }
 0x2ab   : > { %v484_v18 = vor.u32 1.1754944e-38, %v483_v13  ;;  %vm482_vm9 = vcmp.eq.f32.partialorder %v481_v15, 8.507059e+37 }
 0x2af   : > { %v916_v9 = vpop.eup %915 }
 0x2b0   : > { %v473_v10 = vmul.f32 %v916_v9, %v465_v8  ;;  %v467_v11 = vpop.xlane.xlu2 %466  ;;  %vm478_vm6 = vweird.f32 %v916_v9 }
 0x2b1   : > { %917 = vrcp.f32 %v467_v11  ;;  %vm479_vm8 = vmor %vm477_vm7, %vm478_vm6  ;;  %v498_v25 = vand.u32 2147483648, %v467_v11  ;;  %v496_v27 = vand.u32 2147483647, %v467_v11  ;;  %vm492_vm12 = vweird.f32 %v467_v11 }
 0x2b2   : > { %v474_v12 = vsub.f32 1.0, %v473_v10 }
 0x2b3   : > { %v499_v30 = vor.u32 1.1754944e-38, %v498_v25  ;;  %vm497_vm14 = vcmp.eq.f32.partialorder %v496_v27, 8.507059e+37 }
 0x2b4   : > { %v475_v14 = vmul.f32 %v916_v9, %v474_v12 }
 0x2b6   : > { %v476_v16 = vadd.f32 %v916_v9, %v475_v14 }
 0x2b7   : > { %v918_v17 = vpop.eup %917 }
 0x2b8   : > { %v480_v19 = vsel %vm479_vm8, %v916_v9, %v476_v16  ;;  %v488_v20 = vmul.f32 %v918_v17, %v467_v11  ;;  %v469_v21 = vpop.xlane.xlu0 %468  ;;  %vm493_vm11 = vweird.f32 %v918_v17 }
 0x2b9   : > { %v485_v22 = vsel %vm482_vm9, %v484_v18, %v480_v19  ;;  %919 = vrcp.f32 %v469_v21  ;;  %vm494_vm13 = vmor %vm492_vm12, %vm493_vm11  ;;  %v513_v37 = vand.u32 2147483648, %v469_v21  ;;  %v511_v39 = vand.u32 2147483647, %v469_v21 }
 0x2ba   : > { %v486_v23 = vmul.f32 %v908_v61, %v485_v22  ;;  %v489_v24 = vsub.f32 1.0, %v488_v20  ;;  %vm507_vm0 = vweird.f32 %v469_v21 }
 0x2bb   : > { %v514_v42 = vor.u32 1.1754944e-38, %v513_v37  ;;  %vm512_vm2 = vcmp.eq.f32.partialorder %v511_v39, 8.507059e+37 }
 0x2bc   : > { %533 = vst.msk [vmem:[%s1120_s24] sm:$0xff] %vm532_vm10, %v486_v23  ;;  %v490_v26 = vmul.f32 %v918_v17, %v489_v24 }
 0x2be   : > { %v491_v28 = vadd.f32 %v918_v17, %v490_v26 }
 0x2bf   : > { %v920_v29 = vpop.eup %919 }
 0x2c0   : > { %v495_v31 = vsel %vm494_vm13, %v918_v17, %v491_v28  ;;  %v503_v32 = vmul.f32 %v920_v29, %v469_v21  ;;  %v471_v33 = vpop.xlane.xlu1 %470  ;;  %vm508_vm15 = vweird.f32 %v920_v29 }
 0x2c1   : > { %v500_v34 = vsel %vm497_vm14, %v499_v30, %v495_v31  ;;  %921 = vrcp.f32 %v471_v33  ;;  %vm509_vm1 = vmor %vm507_vm0, %vm508_vm15  ;;  %v528_v48 = vand.u32 2147483648, %v471_v33  ;;  %v526_v50 = vand.u32 2147483647, %v471_v33 }
 0x2c2   : > { %v501_v35 = vmul.f32 %v910_v1, %v500_v34  ;;  %v504_v36 = vsub.f32 1.0, %v503_v32  ;;  %vm522_vm4 = vweird.f32 %v471_v33 }
 0x2c3   : > { %v529_v52 = vor.u32 1.1754944e-38, %v528_v48  ;;  %vm527_vm6 = vcmp.eq.f32.partialorder %v526_v50, 8.507059e+37 }
 0x2c4   : > { %534 = vst.msk [vmem:[%s1120_s24 + $0x8] sm:$0xff] %vm532_vm10, %v501_v35  ;;  %v505_v38 = vmul.f32 %v920_v29, %v504_v36 }
 0x2c6   : > { %v506_v40 = vadd.f32 %v920_v29, %v505_v38 }
 0x2c7   : > { %v922_v41 = vpop.eup %921 }
 0x2c8   : > { %v510_v43 = vsel %vm509_vm1, %v920_v29, %v506_v40  ;;  %v518_v44 = vmul.f32 %v922_v41, %v471_v33  ;;  %vm523_vm3 = vweird.f32 %v922_v41 }
 0x2c9   : > { %v515_v45 = vsel %vm512_vm2, %v514_v42, %v510_v43  ;;  %vm524_vm5 = vmor %vm522_vm4, %vm523_vm3 }
 0x2ca   : > { %v516_v46 = vmul.f32 %v1113_v5, %v515_v45  ;;  %v519_v47 = vsub.f32 1.0, %v518_v44 }
 0x2cc   : > { %535 = vst.msk [vmem:[%s1120_s24 + $0x10] sm:$0xff] %vm532_vm10, %v516_v46  ;;  %v520_v49 = vmul.f32 %v922_v41, %v519_v47 }
 0x2ce   : > { %v521_v51 = vadd.f32 %v922_v41, %v520_v49 }
 0x2d0   : > { %v525_v53 = vsel %vm524_vm5, %v922_v41, %v521_v51  ;;  %543 = sbr.rel (!%p1077_p4) target bundleno = 764 (0x2fc), region = 52 }
 0x2d1   : > { %v530_v54 = vsel %vm527_vm6, %v529_v52, %v525_v53 }
 0x2d2   : > { %v531_v55 = vmul.f32 %v1116_v7, %v530_v54 }
 0x2d4   : > { %536 = vst.msk [vmem:[%s1120_s24 + $0x18] sm:$0xff] %vm532_vm10, %v531_v55 }
 0x2d5   : > { %s1204_s18 = smov (!%p546_p8, %s545_s18), 4 }
 0x2d6   : > { %s792_s23 = sshll.u32 %s1204_s18, 3 }
 0x2d7   : > { %p795_p9 = scmp.eq.s32.totalorder %s792_s23, 0 }
 0x2d8   : > { %s1145_s26 = sshrl.u32 (!%p795_p9), %s1204_s18, 2 }
 0x2d9   : > { %554 = sbr.rel (%p795_p9) target bundleno = 764 (0x2fc), region = 56  ;;  %p796_p10 = scmp.le.s32.totalorder (!%p795_p9), %s1145_s26, 0 }
 0x2de   : > { %721 = sbr.rel (%p796_p10) target bundleno = 747 (0x2eb), region = 132  ;;  %s1197_s27 = smov (!%p796_p10), %s1139_s22 }
 0x2df   : > { %s1198_s9 = smov (!%p796_p10), %s1120_s24  ;;  %s1154_s12 = smov (!%p796_p10), 0  }
 0x2e0   : > { %s991_s29 = smov (!%p796_p10), 0  }
 0x2e3 LB: >> { %v623_v56 = vld [vmem:[%s985_s9] sm:$0xff]  ;;  %v625_v57 = vld [vmem:[%s985_s9 + $0x8] sm:$0xff]  ;;  %v627_v58 = vld [vmem:[%s985_s9 + $0x10] sm:$0xff]  ;;  %s631_s30 = sadd.s32 1, %s989_s12  ;;  %s617_s29 = sadd.s32 1, %s993_s29   ;;  %s993_s29 = sphi %s991_s29, %s617_s29   ;;  %s989_s12 = sphi %s1154_s12, %s1199_s12   ;;  %s985_s9 = sphi %s1198_s9, %s636_s9   ;;  %s981_s27 = sphi %s1197_s27, %s637_s27  }
 0x2e4   : >> { %624 = vst [vmem:[%s981_s27] sm:$0xff] %v623_v56  ;;  %v629_v59 = vld [vmem:[%s985_s9 + $0x18] sm:$0xff]  ;;  %p632_p11 = scmp.ge.s32.totalorder %s631_s30, %s1145_s26  ;;  %p616_p12 = scmp.ge.s32.totalorder %s617_s29, %s1145_s26 }
 0x2e5   : >> { %626 = vst [vmem:[%s981_s27 + $0x8] sm:$0xff] %v625_v57 }
 0x2e6   : >> { %628 = vst [vmem:[%s981_s27 + $0x10] sm:$0xff] %v627_v58  ;;  %s1206_s30 = smov (%p632_p11, %s631_s30), 0  ;;  %619 = sbr.rel (!%p616_p12) target bundleno = 739 (0x2e3), region = 138 }
 0x2e7   : >> { %630 = vst [vmem:[%s981_s27 + $0x18] sm:$0xff] %v629_v59  ;;  %s797_s10 = sshll.u32 %s1206_s30, 5  ;;  %s1199_s12 = smov %s1206_s30 }
 0x2e8   : >> { %s636_s9 = scalar_lea.vmem %s1120_s24, %s797_s10 [#allocation2]   ;;  %s637_s27 = scalar_lea.vmem %s1139_s22, %s797_s10  }
 0x2eb PF: > { %s1170_s11 = sand.u32 3, %s1204_s18   ;;  %s811_s13 = sshll.u32 %s1145_s26, 5 }
 0x2ec   : > { %s642_s14 = scalar_lea.vmem %s1120_s24, %s811_s13 [#allocation2]   ;;  %s644_s15 = scalar_lea.vmem %s1139_s22, %s811_s13  }
 0x2ed   : > { %p802_p13 = scmp.le.s32.totalorder %s1170_s11, 0 }
 0x2ee   : > { %s995_s16 = smov (!%p802_p13), %s644_s15   ;;  %s999_s17 = smov (!%p802_p13), %s642_s14  }
 0x2ef   : > { %735 = sbr.rel (%p802_p13) target bundleno = 764 (0x2fc), region = 143  ;;  %s1003_s19 = smov (!%p802_p13), 0  }
 0x2f0   : > { %s1007_s20 = smov (!%p802_p13), 0  }
 0x2f4 LB: >> { %v654_v60 = vld [vmem:[%s1001_s17] sm:$0xff]  ;;  %s656_s18 = sadd.s32 1, %s1005_s19  ;;  %s648_s20 = sadd.s32 1, %s1009_s20   ;;  %s1009_s20 = sphi %s1007_s20, %s648_s20   ;;  %s1005_s19 = sphi %s1003_s19, %s1004_s19   ;;  %s1001_s17 = sphi %s999_s17, %s661_s17   ;;  %s997_s16 = sphi %s995_s16, %s662_s16  }
 0x2f5   : >> { %655 = vst [vmem:[%s997_s16] sm:$0xff] %v654_v60  ;;  %p657_p0 = scmp.ge.s32.totalorder %s656_s18, %s1170_s11  ;;  %p647_p1 = scmp.ge.s32.totalorder %s648_s20, %s1170_s11 }
 0x2f7   : >> { %s1208_s18 = smov (%p657_p0, %s656_s18), 0  ;;  %650 = sbr.rel (!%p647_p1) target bundleno = 756 (0x2f4), region = 149 }
 0x2f8   : >> { %s803_s24 = sshll.u32 %s1208_s18, 3  ;;  %s1004_s19 = smov %s1208_s18  }
 0x2f9   : >> { %s661_s17 = scalar_lea.vmem %s642_s14, %s803_s24 [#allocation2]   ;;  %s662_s16 = scalar_lea.vmem %s644_s15, %s803_s24  }
 0x2fc PF: > { %p14_p2 = scmp.ge.s32.totalorder %s1067_s28, 9   ;;  %s1200_s24 = smov %s973_s25 }
 0x2fd   : > { %s1201_s25 = smov %s1075_s8  ;;  %s1202_s26 = smov %s1067_s28 }
 0x2fe   :  { %16 = sbr.rel (!%p14_p2) target bundleno = 2 (0x2), region = 160 }

</bundles_post_ra>
